<compile_context>
chip_gen: v7x
topology: tpu7x:2x2x1
jax: 0.10.0
libtpu: 0.0.40
codegen_flags: <defaults>
</compile_context>

<pallas_src>
from functools import partial

import jax
import jax.numpy as jnp
from jax.experimental import pallas as pl
from jax.experimental.pallas import tpu as pltpu

EPS = 1e-5  # matches torch.nn.LayerNorm default


def _round_up(x, m):
    return (x + m - 1) // m * m


def _round_down(x, m):
    return x // m * m


def _vmem_capacity_bytes():
    try:
        info = pltpu.get_tpu_info()
        cap = getattr(info, "vmem_capacity_bytes", None)
        if cap:
            return int(cap)
    except Exception:
        pass
    return 64 * 1024 * 1024  # conservative (v7x-sized) fallback


def _ln_normalize(x_f32, d_real):
    """One-pass LayerNorm: mean = Σx/d, var = Σx²/d − mean².

    Padded feature lanes of x are zero, so both sums are exact for the real
    dim; padded lanes of the normalized result hit zero rows of W' and
    contribute nothing to the matmul."""
    inv_d = 1.0 / d_real
    s1 = jnp.sum(x_f32, axis=-1, keepdims=True)
    s2 = jnp.sum(x_f32 * x_f32, axis=-1, keepdims=True)
    mean = s1 * inv_d
    var = s2 * inv_d - mean * mean
    inv = jax.lax.rsqrt(var + EPS)
    return (x_f32 - mean) * inv


def prenorm_resident_kernel(x_ref, w_ref, bias_ref, o_ref, *, d_real):
    """One row-tile step; full (gamma-folded) weight resident in VMEM."""
    normed = _ln_normalize(x_ref[...].astype(jnp.float32), d_real)
    y = jnp.dot(normed.astype(w_ref.dtype), w_ref[...],
                preferred_element_type=jnp.float32)
    o_ref[...] = (y + bias_ref[...].astype(jnp.float32)).astype(o_ref.dtype)


def prenorm_streamed_kernel(x_ref, w_ref, bias_ref, o_ref, normed_ref, *, d_real):
    """(row tile i, W column panel j); LN computed once per row tile (j == 0)."""
    @pl.when(pl.program_id(1) == 0)
    def _():
        normed = _ln_normalize(x_ref[...].astype(jnp.float32), d_real)
        normed_ref[...] = normed.astype(normed_ref.dtype)

    y = jnp.dot(normed_ref[...], w_ref[...], preferred_element_type=jnp.float32)
    o_ref[...] = (y + bias_ref[...].astype(jnp.float32)).astype(o_ref.dtype)


def prenorm_linear(x, gamma, beta, w, bias):
    """x: (B, S, D). Returns fn(LayerNorm(x)) with fn = Linear(D, D)."""
    B, S, D = x.shape
    N = B * S
    out_dtype = x.dtype

    # ---- Fold the LayerNorm affine into the linear layer (one-time, in XLA).
    #  LN(x) @ W^T + b == xhat @ (gamma[:,None]*W^T) + (beta @ W^T + b)
    w_f32 = w.astype(jnp.float32)
    wT = (gamma.astype(jnp.float32)[:, None] * w_f32.T).astype(w.dtype)   # (Din, Dout)
    bias_f = beta.astype(jnp.float32) @ w_f32.T + bias.astype(jnp.float32)  # (Dout,)

    # ---- Geometry: feature pad only if D is not lane-aligned; no row padding.
    Dp = _round_up(D, 128)
    Dop = Dp
    isz_x = jnp.dtype(out_dtype).itemsize
    isz_w = jnp.dtype(w.dtype).itemsize

    cap = _vmem_capacity_bytes()
    vmem_cap = (cap * 3) // 4          # headroom for compiler scratch / pipeline
    resident_thresh = cap // 4         # ~16 MiB on v7x, ~32 MiB on v5e/v6e

    # ---- Row tile: scale with D, bounded by N, >= 2 tiles for megacore.
    if Dp <= 512:
        tm = 1024
    elif Dp <= 1024:
        tm = 512
    else:
        tm = 256
    if N <= 8:
        tm = N                          # block == full row extent (allowed)
    else:
        tm = min(tm, _round_up(N, 8))
        if pl.cdiv(N, tm) < 2:          # give both v7x TensorCores work
            tm = max(8, _round_up(pl.cdiv(N, 2), 8))

    # ---- Operands (feature pad only).
    x2 = x.reshape(N, D)
    if Dp > D:
        x2 = jnp.pad(x2, ((0, 0), (0, Dp - D)))
        wTp = jnp.pad(wT, ((0, Dp - D), (0, Dop - D)))
        bias2 = jnp.pad(bias_f, (0, Dop - D)).reshape(1, Dop)
    else:
        wTp = wT
        bias2 = bias_f.reshape(1, Dop)

    w_bytes = Dp * Dop * isz_w
    resident = w_bytes <= resident_thresh

    if resident:
        def footprint(tm_):
            return (2 * tm_ * Dp * isz_x          # x tiles (double-buffered)
                    + 2 * w_bytes                 # W (worst case double-buffered)
                    + 2 * 8 * Dop * 4             # bias (sublane padded, f32)
                    + 2 * tm_ * Dop * isz_x)      # output tiles
    else:
        tn = min(512, Dop)
        if Dop >= 256:
            tn = max(256, _round_down(tn, 256))   # 256-multiple panels (v6e/v7x MXU)

        def footprint(tm_):
            return (2 * tm_ * Dp * isz_x
                    + 2 * Dp * tn * isz_w         # W column panels
                    + 2 * 8 * tn * 4              # bias panels
                    + 2 * tm_ * tn * isz_x        # output tiles
                    + tm_ * Dp * isz_w)           # normalized-row scratch

    while footprint(tm) > vmem_cap and tm > 8:
        tm = max(8, _round_down(tm // 2, 8))

    grid_i = pl.cdiv(N, tm)
    vmem_limit = int(min(max(footprint(tm) + (8 << 20), 32 << 20), vmem_cap))

    def run(single_buffer_const_operands):
        const_kw = (dict(pipeline_mode=pl.Buffered(1))
                    if single_buffer_const_operands else {})
        if resident:
            grid_spec = pltpu.PrefetchScalarGridSpec(
                num_scalar_prefetch=0,
                grid=(grid_i,),
                in_specs=[
                    pl.BlockSpec((tm, Dp), lambda i: (i, 0)),             # x rows
                    pl.BlockSpec((Dp, Dop), lambda i: (0, 0), **const_kw),  # W'
                    pl.BlockSpec((1, Dop), lambda i: (0, 0), **const_kw),   # bias'
                ],
                out_specs=pl.BlockSpec((tm, Dop), lambda i: (i, 0)),
            )
            kern = partial(prenorm_resident_kernel, d_real=D)
            dims = ("parallel",)
        else:
            grid_j = pl.cdiv(Dop, tn)
            grid_spec = pltpu.PrefetchScalarGridSpec(
                num_scalar_prefetch=0,
                grid=(grid_i, grid_j),
                in_specs=[
                    pl.BlockSpec((tm, Dp), lambda i, j: (i, 0)),   # x rows
                    pl.BlockSpec((Dp, tn), lambda i, j: (0, j)),   # W' column panel
                    pl.BlockSpec((1, tn), lambda i, j: (0, j)),    # bias panel
                ],
                out_specs=pl.BlockSpec((tm, tn), lambda i, j: (i, j)),
                scratch_shapes=[pltpu.VMEM((tm, Dp), wTp.dtype)],  # normalized rows
            )
            kern = partial(prenorm_streamed_kernel, d_real=D)
            dims = ("parallel", "arbitrary")

        return pl.pallas_call(
            kern,
            out_shape=jax.ShapeDtypeStruct((N, Dop), out_dtype),
            grid_spec=grid_spec,
            compiler_params=pltpu.CompilerParams(
                dimension_semantics=dims,
                vmem_limit_bytes=vmem_limit,
            ),
        )(x2, wTp, bias2)

    if resident:
        try:
            out = run(True)     # single-buffer the grid-invariant W / bias blocks
        except Exception:
            out = run(False)    # fall back if Buffered(1) is not supported
    else:
        out = run(False)

    if Dop > D:
        out = out[:, :D]
    return out.reshape(B, S, D)


def prenorm_linear_ref(x, gamma, beta, w, bias):
    """Pure-JAX reference mirroring torch: Linear(LayerNorm(x))."""
    xf = x.astype(jnp.float32)
    mean = jnp.mean(xf, axis=-1, keepdims=True)
    var = jnp.mean((xf - mean) ** 2, axis=-1, keepdims=True)
    normed = (xf - mean) / jnp.sqrt(var + EPS) * gamma + beta
    return (normed @ w.T.astype(jnp.float32) + bias).astype(x.dtype)


if __name__ == "__main__":
    key = jax.random.PRNGKey(0)
    B, S, D = 2, 8, 32  # batch=2, seq=8, hidden(dim)=32

    kx, kw, kb = jax.random.split(key, 3)
    x = jax.random.normal(kx, (B, S, D), dtype=jnp.float32)

    # LayerNorm params (torch default init: weight=1, bias=0)
    gamma = jnp.ones((D,), jnp.float32)
    beta = jnp.zeros((D,), jnp.float32)

    # TODO(synk): `fn` in PreNorm is an arbitrary module; instantiated here as Linear(D, D).
    w = jax.random.normal(kw, (D, D), dtype=jnp.float32) * 0.05
    bias = jax.random.normal(kb, (D,), dtype=jnp.float32) * 0.05

    out = prenorm_linear(x, gamma, beta, w, bias)
    out = jax.block_until_ready(out)

    ref = prenorm_linear_ref(x, gamma, beta, w, bias)
    assert out.shape == (B, S, D)
    assert jnp.max(jnp.abs(out - ref)) < 1e-4, "mismatch vs reference"

    print("KERNEL_OK")
</pallas_src>

<mosaic_0001>
module attributes {stable_mosaic.version = 11 : i64} {
  func.func @prenorm_resident_kernel(%arg0: i32, %arg1: memref<8x128xf32, #tpu.memory_space<vmem>>, %arg2: memref<128x128xf32, #tpu.memory_space<vmem>>, %arg3: memref<1x128xf32, #tpu.memory_space<vmem>>, %arg4: memref<8x128xf32, #tpu.memory_space<vmem>>) attributes {dimension_semantics = [#tpu.dimension_semantics<parallel>], iteration_bounds = array<i64: 2>, scalar_prefetch = 0 : i64, scratch_operands = 0 : i64, tpu.core_type = #tpu.core_type<tc>, window_params = [{transform_indices = @transform_0, window_bounds = array<i64: 8, 128>}, {pipeline_mode = #tpu.pipeline_mode<synchronous>, transform_indices = @transform_1, window_bounds = array<i64: 128, 128>}, {pipeline_mode = #tpu.pipeline_mode<synchronous>, transform_indices = @transform_2, window_bounds = array<i64: 1, 128>}, {transform_indices = @transform_3, window_bounds = array<i64: 8, 128>}]} {
    %c0 = arith.constant 0 : index
    %c0_0 = arith.constant 0 : index
    %0 = vector.load %arg1[%c0, %c0_0] : memref<8x128xf32, #tpu.memory_space<vmem>>, vector<8x128xf32>
    %cst = arith.constant dense<0.000000e+00> : vector<8xf32>
    %1 = vector.multi_reduction <add>, %0, %cst [1] : vector<8x128xf32> to vector<8xf32>
    %2 = vector.shape_cast %1 : vector<8xf32> to vector<8x1xf32>
    %3 = arith.mulf %0, %0 : vector<8x128xf32>
    %cst_1 = arith.constant dense<0.000000e+00> : vector<8xf32>
    %4 = vector.multi_reduction <add>, %3, %cst_1 [1] : vector<8x128xf32> to vector<8xf32>
    %5 = vector.shape_cast %4 : vector<8xf32> to vector<8x1xf32>
    %cst_2 = arith.constant 3.125000e-02 : f32
    %6 = vector.broadcast %cst_2 : f32 to vector<8x1xf32>
    %7 = arith.mulf %2, %6 : vector<8x1xf32>
    %cst_3 = arith.constant 3.125000e-02 : f32
    %8 = vector.broadcast %cst_3 : f32 to vector<8x1xf32>
    %9 = arith.mulf %5, %8 : vector<8x1xf32>
    %10 = arith.mulf %7, %7 : vector<8x1xf32>
    %11 = arith.subf %9, %10 : vector<8x1xf32>
    %cst_4 = arith.constant 9.99999974E-6 : f32
    %12 = vector.broadcast %cst_4 : f32 to vector<8x1xf32>
    %13 = arith.addf %11, %12 : vector<8x1xf32>
    %14 = math.rsqrt %13 : vector<8x1xf32>
    %15 = vector.broadcast %7 : vector<8x1xf32> to vector<8x128xf32>
    %16 = arith.subf %0, %15 : vector<8x128xf32>
    %17 = vector.broadcast %14 : vector<8x1xf32> to vector<8x128xf32>
    %18 = arith.mulf %16, %17 : vector<8x128xf32>
    %c0_5 = arith.constant 0 : index
    %c0_6 = arith.constant 0 : index
    %19 = vector.load %arg2[%c0_5, %c0_6] : memref<128x128xf32, #tpu.memory_space<vmem>>, vector<128x128xf32>
    %cst_7 = arith.constant dense<0.000000e+00> : vector<8x128xf32>
    %20 = tpu.matmul %18, %19, %cst_7 {dimension_numbers = #tpu.dot_dimension_numbers<[1], [0], [0], [1], [0, 0, 1, 1], [], []>} : vector<8x128xf32>, vector<128x128xf32>, vector<8x128xf32> -> vector<8x128xf32>
    %c0_8 = arith.constant 0 : index
    %c0_9 = arith.constant 0 : index
    %21 = vector.load %arg3[%c0_8, %c0_9] : memref<1x128xf32, #tpu.memory_space<vmem>>, vector<1x128xf32>
    %22 = vector.broadcast %21 : vector<1x128xf32> to vector<8x128xf32>
    %23 = arith.addf %20, %22 : vector<8x128xf32>
    %c0_10 = arith.constant 0 : index
    %c0_11 = arith.constant 0 : index
    %24 = vector.load %arg4[%c0_10, %c0_11] : memref<8x128xf32, #tpu.memory_space<vmem>>, vector<8x128xf32>
    tpu.vector_store %arg4[%c0_10, %c0_11], %23 {strides = array<i32>} : memref<8x128xf32, #tpu.memory_space<vmem>>, vector<8x128xf32>,
    return
  }
  func.func @transform_0(%arg0: i32) -> (i32, i32) {
    %c0_i32 = arith.constant 0 : i32
    %c0_i32_0 = arith.constant 0 : i32
    return %arg0, %c0_i32 : i32, i32
  }
  func.func @transform_1(%arg0: i32) -> (i32, i32) {
    %c0_i32 = arith.constant 0 : i32
    %c0_i32_0 = arith.constant 0 : i32
    %c0_i32_1 = arith.constant 0 : i32
    return %c0_i32, %c0_i32_0 : i32, i32
  }
  func.func @transform_2(%arg0: i32) -> (i32, i32) {
    %c0_i32 = arith.constant 0 : i32
    %c0_i32_0 = arith.constant 0 : i32
    %c0_i32_1 = arith.constant 0 : i32
    return %c0_i32, %c0_i32_0 : i32, i32
  }
  func.func @transform_3(%arg0: i32) -> (i32, i32) {
    %c0_i32 = arith.constant 0 : i32
    %c0_i32_0 = arith.constant 0 : i32
    return %arg0, %c0_i32 : i32, i32
  }
}

module attributes {stable_mosaic.version = 11 : i64} {
  func.func @prenorm_resident_kernel(%arg0: i32, %arg1: memref<8x128xf32, #tpu.memory_space<vmem>>, %arg2: memref<128x128xf32, #tpu.memory_space<vmem>>, %arg3: memref<1x128xf32, #tpu.memory_space<vmem>>, %arg4: memref<8x128xf32, #tpu.memory_space<vmem>>) attributes {dimension_semantics = [#tpu.dimension_semantics<parallel>], iteration_bounds = array<i64: 2>, scalar_prefetch = 0 : i64, scratch_operands = 0 : i64, tpu.core_type = #tpu.core_type<tc>, window_params = [{transform_indices = @transform_0, window_bounds = array<i64: 8, 128>}, {pipeline_mode = #tpu.pipeline_mode<synchronous>, transform_indices = @transform_1, window_bounds = array<i64: 128, 128>}, {pipeline_mode = #tpu.pipeline_mode<synchronous>, transform_indices = @transform_2, window_bounds = array<i64: 1, 128>}, {transform_indices = @transform_3, window_bounds = array<i64: 8, 128>}]} {
    %c0 = arith.constant 0 : index
    %c0_0 = arith.constant 0 : index
    %0 = vector.load %arg1[%c0, %c0_0] : memref<8x128xf32, #tpu.memory_space<vmem>>, vector<8x128xf32>
    %cst = arith.constant dense<0.000000e+00> : vector<8xf32>
    %1 = vector.multi_reduction <add>, %0, %cst [1] : vector<8x128xf32> to vector<8xf32>
    %2 = vector.shape_cast %1 : vector<8xf32> to vector<8x1xf32>
    %3 = arith.mulf %0, %0 : vector<8x128xf32>
    %cst_1 = arith.constant dense<0.000000e+00> : vector<8xf32>
    %4 = vector.multi_reduction <add>, %3, %cst_1 [1] : vector<8x128xf32> to vector<8xf32>
    %5 = vector.shape_cast %4 : vector<8xf32> to vector<8x1xf32>
    %cst_2 = arith.constant 3.125000e-02 : f32
    %6 = vector.broadcast %cst_2 : f32 to vector<8x1xf32>
    %7 = arith.mulf %2, %6 : vector<8x1xf32>
    %cst_3 = arith.constant 3.125000e-02 : f32
    %8 = vector.broadcast %cst_3 : f32 to vector<8x1xf32>
    %9 = arith.mulf %5, %8 : vector<8x1xf32>
    %10 = arith.mulf %7, %7 : vector<8x1xf32>
    %11 = arith.subf %9, %10 : vector<8x1xf32>
    %cst_4 = arith.constant 9.99999974E-6 : f32
    %12 = vector.broadcast %cst_4 : f32 to vector<8x1xf32>
    %13 = arith.addf %11, %12 : vector<8x1xf32>
    %14 = math.rsqrt %13 : vector<8x1xf32>
    %15 = vector.broadcast %7 : vector<8x1xf32> to vector<8x128xf32>
    %16 = arith.subf %0, %15 : vector<8x128xf32>
    %17 = vector.broadcast %14 : vector<8x1xf32> to vector<8x128xf32>
    %18 = arith.mulf %16, %17 : vector<8x128xf32>
    %c0_5 = arith.constant 0 : index
    %c0_6 = arith.constant 0 : index
    %19 = vector.load %arg2[%c0_5, %c0_6] : memref<128x128xf32, #tpu.memory_space<vmem>>, vector<128x128xf32>
    %cst_7 = arith.constant dense<0.000000e+00> : vector<8x128xf32>
    %20 = tpu.matmul %18, %19, %cst_7 {dimension_numbers = #tpu.dot_dimension_numbers<[1], [0], [0], [1], [0, 0, 1, 1], [], []>} : vector<8x128xf32>, vector<128x128xf32>, vector<8x128xf32> -> vector<8x128xf32>
    %c0_8 = arith.constant 0 : index
    %c0_9 = arith.constant 0 : index
    %21 = vector.load %arg3[%c0_8, %c0_9] : memref<1x128xf32, #tpu.memory_space<vmem>>, vector<1x128xf32>
    %22 = vector.broadcast %21 : vector<1x128xf32> to vector<8x128xf32>
    %23 = arith.addf %20, %22 : vector<8x128xf32>
    %c0_10 = arith.constant 0 : index
    %c0_11 = arith.constant 0 : index
    %24 = vector.load %arg4[%c0_10, %c0_11] : memref<8x128xf32, #tpu.memory_space<vmem>>, vector<8x128xf32>
    tpu.vector_store %arg4[%c0_10, %c0_11], %23 {strides = array<i32>} : memref<8x128xf32, #tpu.memory_space<vmem>>, vector<8x128xf32>,
    return
  }
  func.func @transform_0(%arg0: i32) -> (i32, i32) {
    %c0_i32 = arith.constant 0 : i32
    %c0_i32_0 = arith.constant 0 : i32
    return %arg0, %c0_i32 : i32, i32
  }
  func.func @transform_1(%arg0: i32) -> (i32, i32) {
    %c0_i32 = arith.constant 0 : i32
    %c0_i32_0 = arith.constant 0 : i32
    %c0_i32_1 = arith.constant 0 : i32
    return %c0_i32, %c0_i32_0 : i32, i32
  }
  func.func @transform_2(%arg0: i32) -> (i32, i32) {
    %c0_i32 = arith.constant 0 : i32
    %c0_i32_0 = arith.constant 0 : i32
    %c0_i32_1 = arith.constant 0 : i32
    return %c0_i32, %c0_i32_0 : i32, i32
  }
  func.func @transform_3(%arg0: i32) -> (i32, i32) {
    %c0_i32 = arith.constant 0 : i32
    %c0_i32_0 = arith.constant 0 : i32
    return %arg0, %c0_i32 : i32, i32
  }
}

</mosaic_0001>

<bundles_post_ra>
// kernel: tpu_custom_call.1
= control target key start
LH: loop header
LB: loop body
LE: loop exit
PB: predicated region body
PF: predicated region fallthrough
CT: control target
= control target key end

     0   :  { %8 = vsyncpa [#allocation3], 0  ;;  %s919_s0 = inlined_call_operand.hbm [shape: f32[16,128], index: 0, kind: input, shape index: {}]   ;;  %s920_s1 = inlined_call_operand.hbm [shape: f32[128,128], index: 1, kind: input, shape index: {}]   ;;  %s921_s2 = inlined_call_operand.vmem [shape: f32[1,128], index: 2, kind: input, shape index: {}]   ;;  %s922_s3 = inlined_call_operand.hbm [shape: f32[16,128], index: 3, kind: output, shape index: {}]  }
   0x1   :  { %10 = vsyncpa [#allocation3 + $0x1], 0 }
   0x2   :  { %11 = vsyncpa [#allocation6], 0 }
   0x3   :  { %12 = vsyncpa [#allocation4], 0 }
   0x4   :  { %14 = vsyncpa [#allocation4 + $0x1], 0  ;;  %s716_s12 = smov 0   ;;  %s718_s13 = smov 0  }
   0x5   :  { %s720_s14 = smov 0   ;;  %s722_s15 = smov 0  }
   0x6 LB: > { %s737_s16 = sadd.s32 4294967295, %s686_s15   ;;  %s403_s17 = sadd.s32 4294967294, %s686_s15   ;;  %s686_s15 = sphi %s722_s15, %s942_s15   ;;  %s682_s14 = sphi %s720_s14, %s941_s14   ;;  %s678_s13 = sphi %s718_s13, %s940_s13   ;;  %s674_s12 = sphi %s716_s12, %s939_s12  }
   0x7   : > { %p40_p0 = scmp.ne.s32.totalorder %s678_s13, %s674_s12  ;;  %p923_p1 = scmp.eq.s32.totalorder %s737_s16, 0 }
   0x8   : > { %p112_p3 = scmp.eq.s32.totalorder %s403_s17, 1  ;;  %p404_p5 = scmp.ge.s32.totalorder %s686_s15, 1 }
   0x9   : > { %p746_p4 = por %p923_p1, %p40_p0  ;;  %p119_p7 = scmp.lt.s32.totalorder %s686_s15, 3 }
   0xa   : > { %p751_p6 = por %p112_p3, %p40_p0  ;;  %s688_s21 = smov [#allocation5]  }
   0xb   : > { %s926_s18 = scalar_select %p746_p4, 1, 0 }
   0xc   : > { %s927_s19 = scalar_select %p751_p6, 1, 0 }
   0xd   : > { %p756_p8 = pnand %p404_p5, %p119_p7  ;;  %s131_s22 = sshll.u32 %s688_s21, 4  ;;  %s760_s22 = int_to_ptr.vmem [resolvable:$true] %s131_s22 }
   0xe   : > { %s772_s24 = sadd.s32 1, %s686_s15   ;;  %s27_s25 = sadd.s32 1, %s682_s14 }
   0xf   : > { %s928_s20 = scalar_select %p756_p8, 1, 0 }
  0x10   : > { %p502_p9 = pneg %p756_p8  ;;  %s24_s26 = ssub.s32 %s686_s15, %s772_s24 }
  0x11   : > { %s558_s29 = scalar_lea.hbm %s920_s1, 2048 }
  0x12   : > { %p767_p11 = pnand %p502_p9, %p923_p1  ;;  %p559_p12 = scmp.ne.s32.totalorder %s920_s1, %s558_s29 }
  0x13   : > { %p565_p5 = scmp.lt.u32.totalorder %s558_s29, %s920_s1 }
  0x14   : > { %p560_p13 = pneg %p767_p11 }
  0x16   : > { %p561_p0 = pnand %p560_p13, %p559_p12 }
  0x18   : > { %p562_p3 = pneg %p561_p0 }
  0x1a   : > { %p567_p7 = pnand %p565_p5, %p562_p3 }
  0x1c   : > { %570 = shalt.err (!%p567_p7)
}
  0x1d   : > { %s571_s7 = scalar_lea.vmem %s760_s22, 2048  ;;  %p579_p2 = scmp.lt.s32.totalorder %s760_s22, %s760_s22 }
  0x1e   : > { %p572_p9 = scmp.ne.s32.totalorder %s760_s22, %s571_s7  ;;  %p580_p6 = scmp.lt.s32.totalorder %s571_s7, %s571_s7 }
  0x20   : > { %p574_p10 = pnand %p572_p9, %p560_p13  ;;  %p581_p4 = por %p580_p6, %p579_p2 }
  0x22   : > { %p575_p1 = pneg %p574_p10 }
  0x24   : > { %p582_p8 = pnand %p581_p4, %p575_p1 }
  0x26   : > { %585 = shalt.err (!%p582_p8)
}
  0x27   : > { %s689_s8 = smov 128   ;;  %s690_s9 = smov 8  }
  0x28   : > { %505 = dma.hbm_to_vmem [thread:$0]  (!%p767_p11), %s920_s1, 2048, %s760_s22, [#allocation6], %s689_s8, %s689_s8, %s690_s9  }
  0x29   : > { %p25_p2 = scmp.eq.s32.totalorder %s24_s26, 0  ;;  %p34_p1 = scmp.ne.s32.totalorder %s682_s14, %s678_s13 }
  0x2a   : > { %p35_p4 = scmp.eq.s32.totalorder %s686_s15, 0  ;;  %p515_p6 = scmp.lt.s32.totalorder %s686_s15, 2 }
  0x2b   : > { %s803_s17 = scalar_select %p25_p2, %s682_s14, %s27_s25  }
  0x2c   : > { %p36_p8 = por %p35_p4, %p34_p1  ;;  %p930_p10 = scmp.eq.s32.totalorder %s737_s16, 1 }
  0x2d   : > { %s148_s27 = sand.u32 1, %s682_s14   ;;  %s408_s28 = sshll.u32 %s686_s15, 7 }
  0x2e   : > { %p807_p12 = por %p930_p10, %p34_p1  ;;  %s407_s29 = sshll.u32 %s148_s27, 3 }
  0x2f   : > { %s816_s4 = scalar_lea.hbm %s919_s0, %s408_s28  ;;  %s152_s22 = scalar_lea.vmem [#allocation2], %s407_s29 }
  0x30   : > { %s159_s25 = sshll.u32 %s152_s22, 4  ;;  %p818_p11 = pnand %p515_p6, %p36_p8  ;;  %s822_s25 = int_to_ptr.vmem [resolvable:$true] %s159_s25 }
  0x31   : > { %s149_s5 = scalar_lea.sflag [#allocation3], %s148_s27  ;;  %s586_s6 = scalar_lea.hbm %s816_s4, 128 }
  0x32   : > { %p587_p13 = scmp.ne.s32.totalorder %s816_s4, %s586_s6  ;;  %p588_p0 = pneg %p818_p11 }
  0x33   : > { %s591_s9 = scalar_lea.hbm %s919_s0, 256  ;;  %p592_p7 = scmp.lt.u32.totalorder %s816_s4, %s919_s0 }
  0x34   : > { %p589_p3 = pnand %p588_p0, %p587_p13  ;;  %p593_p9 = scmp.lt.u32.totalorder %s591_s9, %s586_s6 }
  0x35   : > { %p595_p1 = scmp.lt.u32.totalorder %s586_s6, %s816_s4 }
  0x36   : > { %p590_p5 = pneg %p589_p3  ;;  %p594_p2 = por %p593_p9, %p592_p7 }
  0x38   : > { %p596_p4 = por %p595_p1, %p594_p2 }
  0x3a   : > { %p597_p6 = pnand %p596_p4, %p590_p5 }
  0x3c   : > { %600 = shalt.err (!%p597_p6)
}
  0x3d   : > { %s601_s27 = scalar_lea.vmem %s822_s25, 128  ;;  %s691_s28 = smov [#allocation2]  }
  0x3e   : > { %p602_p8 = scmp.ne.s32.totalorder %s822_s25, %s601_s27  ;;  %s606_s29 = sshll.u32 %s691_s28, 4  ;;  %s607_s29 = int_to_ptr.vmem [resolvable:$false] %s606_s29 }
  0x3f   : > { %s608_s23 = scalar_lea.vmem %s607_s29, 256  ;;  %p609_p3 = scmp.lt.s32.totalorder %s822_s25, %s607_s29 }
  0x40   : > { %p604_p10 = pnand %p602_p8, %p588_p0  ;;  %p610_p7 = scmp.lt.s32.totalorder %s608_s23, %s601_s27 }
  0x42   : > { %p605_p13 = pneg %p604_p10  ;;  %p611_p9 = por %p610_p7, %p609_p3 }
  0x44   : > { %p612_p2 = pnand %p611_p9, %p605_p13 }
  0x46   : > { %615 = shalt.err (!%p612_p2)
}
  0x47   : > { %509 = dma.hbm_to_vmem [thread:$0]  (!%p818_p11), %s816_s4, 128, %s822_s25, %s149_s5  }
  0x48   : > { %p933_p5 = scmp.ne.s32.totalorder %s928_s20, 0 }
  0x49   : > { %s852_s30 = sand.u32 (!%p933_p5), 1, %s678_s13   ;;  %p934_p0 = scmp.ne.s32.totalorder (!%p933_p5), %s926_s18, 0 }
  0x4a   : > { %168 = sbr.rel (%p933_p5) target bundleno = 479 (0x1df), region = 32  ;;  %s410_s22 = sshll.u32 (!%p933_p5), %s852_s30, 3 }
  0x4b   : > { %s171_s6 = scalar_lea.sflag (!%p933_p5), [#allocation3], %s852_s30  ;;  %s174_s7 = scalar_lea.vmem (!%p933_p5), [#allocation2], %s410_s22 }
  0x51   : > { %661 = dma.done.wait (%p934_p0), %s171_s6, 128  }
  0x52   : > { %663 = vsyncadd (%p934_p0), %s171_s6, 4294967168  ;;  %p935_p11 = scmp.eq.s32.totalorder %s737_s16, 0 }
  0x54   : > { %665 = dma.done.wait (%p935_p11), [#allocation6], 2048   ;;  %p936_p1 = pmov %p935_p11 }
  0x55   : > { %v692_v0 = vmov 0.0|0.0   ;;  %v201_v1 = vld [vmem:[%s174_s7] sm:$0xff]  ;;  %v215_v2 = vld [vmem:[#allocation5] sm:$0xff]  ;;  %v216_v3 = vld [vmem:[#allocation5 + $0x8] sm:$0xff]  ;;  %vm693_vm0 = vmmov 0   ;;  %v694_v23 = vmov 0.0  }
  0x56   : > { %667 = vsyncadd (%p936_p1), [#allocation6], 4294965248  ;;  %470 = vmatprep.subr.bf16.mxu0 %v692_v0  ;;  %202 = vadd.xlane.f32.xlu0 %v201_v1  ;;  %v204_v4 = vmul.f32 %v201_v1, %v201_v1  ;;  %v471_v5 = vpack.c.bf16 %v216_v3, %v215_v2  ;;  %v217_v6 = vld [vmem:[#allocation5 + $0x10] sm:$0xff]  ;;  %v218_v7 = vld [vmem:[#allocation5 + $0x18] sm:$0xff]  ;;  %s415_s4 = sshll.u32 %s737_s16, 7  ;;  %s200_s25 = scalar_lea.vmem [#allocation7], %s410_s22 }
  0x57   : > { %v474_v8 = vpack.c.bf16 %v218_v7, %v217_v6  ;;  %v219_v9 = vld [vmem:[#allocation5 + $0x20] sm:$0xff]  ;;  %v220_v10 = vld [vmem:[#allocation5 + $0x28] sm:$0xff]  ;;  %v221_v12 = vld [vmem:[#allocation5 + $0x30] sm:$0xff]  ;;  %467 = vmatprep.mubr.msk.f32.mxu0 %vm693_vm0, %v694_v23  ;;  %s323_s26 = sshll.u32 %s200_s25, 4  ;;  %s875_s9 = scalar_lea.hbm %s922_s3, %s415_s4  ;;  %s877_s26 = int_to_ptr.vmem [resolvable:$true] %s323_s26 }
  0x58   : > { %472 = vmatpush3.bf16.msra.mxu0 %v471_v5  ;;  %v477_v11 = vpack.c.bf16 %v220_v10, %v219_v9  ;;  %v222_v13 = vld [vmem:[#allocation5 + $0x38] sm:$0xff]  ;;  %v223_v15 = vld [vmem:[#allocation5 + $0x40] sm:$0xff]  ;;  %v224_v16 = vld [vmem:[#allocation5 + $0x48] sm:$0xff]  ;;  %s310_s10 = scalar_lea.sflag [#allocation4], %s852_s30  ;;  %s616_s11 = scalar_lea.vmem %s877_s26, 128 }
  0x59   : > { %473 = vmatprep.subr.bf16.mxu0 %v692_v0  ;;  %v480_v14 = vpack.c.bf16 %v222_v13, %v221_v12  ;;  %v483_v17 = vpack.c.bf16 %v224_v16, %v223_v15  ;;  %v225_v18 = vld [vmem:[#allocation5 + $0x50] sm:$0xff]  ;;  %v226_v19 = vld [vmem:[#allocation5 + $0x58] sm:$0xff]  ;;  %v227_v21 = vld [vmem:[#allocation5 + $0x60] sm:$0xff]  ;;  %p617_p4 = scmp.ne.s32.totalorder %s877_s26, %s616_s11  ;;  %s695_s16 = smov [#allocation7]  }
  0x5a   : > { %205 = vadd.xlane.f32.xlu0 %v204_v4  ;;  %v486_v20 = vpack.c.bf16 %v226_v19, %v225_v18  ;;  %v228_v22 = vld [vmem:[#allocation5 + $0x68] sm:$0xff]  ;;  %v229_v25 = vld [vmem:[#allocation5 + $0x70] sm:$0xff]  ;;  %v230_v26 = vld [vmem:[#allocation5 + $0x78] sm:$0xff]  ;;  %s620_s27 = sshll.u32 %s695_s16, 4  ;;  %s621_s27 = int_to_ptr.vmem [resolvable:$false] %s620_s27 }
  0x5b   : > { %v489_v24 = vpack.c.bf16 %v228_v22, %v227_v21  ;;  %v492_v27 = vpack.c.bf16 %v230_v26, %v229_v25  ;;  %v413_v38 = vld [vmem:[%s921_s2] ss:$0 sm:$0xff]  ;;  %p618_p6 = pnand %p617_p4, %p807_p12  ;;  %s622_s28 = scalar_lea.vmem %s621_s27, 256 }
  0x5c   : > { %475 = vmatpush3.bf16.msra.mxu0 %v474_v8  ;;  %p623_p10 = scmp.lt.s32.totalorder %s877_s26, %s621_s27  ;;  %p624_p13 = scmp.lt.s32.totalorder %s622_s28, %s616_s11 }
  0x5d   : > { %476 = vmatprep.subr.bf16.mxu0 %v692_v0  ;;  %p619_p8 = pneg %p618_p6 }
  0x5e   : > { %p625_p3 = por %p624_p13, %p623_p10 }
  0x60   : > { %478 = vmatpush3.bf16.msra.mxu0 %v477_v11  ;;  %p626_p7 = pnand %p625_p3, %p619_p8 }
  0x61   : > { %479 = vmatprep.subr.bf16.mxu0 %v692_v0 }
  0x64   : > { %481 = vmatpush3.bf16.msra.mxu0 %v480_v14 }
  0x65   : > { %482 = vmatprep.subr.bf16.mxu0 %v692_v0 }
  0x68   : > { %484 = vmatpush3.bf16.msra.mxu0 %v483_v17 }
  0x69   : > { %485 = vmatprep.subr.bf16.mxu0 %v692_v0 }
  0x6c   : > { %487 = vmatpush3.bf16.msra.mxu0 %v486_v20 }
  0x6d   : > { %488 = vmatprep.subr.bf16.mxu0 %v692_v0 }
  0x70   : > { %490 = vmatpush3.bf16.msra.mxu0 %v489_v24 }
  0x71   : > { %491 = vmatprep.subr.bf16.mxu0 %v692_v0 }
  0x74   : > { %493 = vmatpush3.bf16.msra.mxu0 %v492_v27 }
  0xe3   : > { %v203_v28 = vpop.xlane.xlu0 %202 }
  0xe4   : > { %v207_v29 = vmul.f32 0.03125, %v203_v28 }
  0xe6   : > { %v209_v31 = vmul.f32 %v207_v29, %v207_v29  ;;  %v213_v35 = vsub.f32 %v201_v1, %v207_v29 }
  0xe7   : > { %v206_v30 = vpop.xlane.xlu0 %205 }
  0xe8   : > { %v208_v32 = vmul.f32 0.03125, %v206_v30 }
  0xea   : > { %v210_v33 = vsub.f32 %v208_v32, %v209_v31 }
  0xec   : > { %v211_v34 = vadd.f32 1e-05, %v210_v33 }
  0xee   : > { %556 = vrsqrt.f32 %v211_v34 }
  0xf8   : > { %v557_v36 = vpop.eup %556 }
  0xf9   : > { %v214_v37 = vmul.f32 %v557_v36, %v213_v35 }
  0xfb   : > { %468 = vmatmul.mubr.f32.vlgmr.msra.gmra.mrb[0].mxu0 %v214_v37 }
 0x1ce   : > { %v304_v39 = vpop.f32.mrb[0].mxu0 }
 0x1cf   : > { %v305_v40 = vadd.f32 %v413_v38, %v304_v39  ;;  %v469_v41 = vpop.f32.mrb[1].mxu0 }
 0x1d1   : > { %308 = vst [vmem:[%s200_s25] sm:$0xff] %v305_v40 }
 0x1d2   : > { %629 = shalt.err (!%p626_p7)
}
 0x1d3   : > { %s630_s29 = scalar_lea.hbm %s875_s9, 128  ;;  %s634_s22 = scalar_lea.hbm %s922_s3, 256 }
 0x1d4   : > { %p631_p9 = scmp.ne.s32.totalorder %s875_s9, %s630_s29  ;;  %p635_p0 = scmp.lt.u32.totalorder %s875_s9, %s922_s3 }
 0x1d5   : > { %p636_p11 = scmp.lt.u32.totalorder %s634_s22, %s630_s29  ;;  %p638_p4 = scmp.lt.u32.totalorder %s630_s29, %s875_s9 }
 0x1d6   : > { %p632_p2 = pnand %p631_p9, %p807_p12 }
 0x1d7   : > { %p637_p1 = por %p636_p11, %p635_p0 }
 0x1d8   : > { %p633_p5 = pneg %p632_p2 }
 0x1d9   : > { %p639_p6 = por %p638_p4, %p637_p1 }
 0x1db   : > { %p640_p8 = pnand %p639_p6, %p633_p5 }
 0x1dd   : > { %643 = shalt.err (!%p640_p8)
}
 0x1de   : > { %500 = dma.vmem_to_hbm [thread:$0]  (%p807_p12), %s877_s26, 128, %s875_s9, %s310_s10  }
 0x1df PF: > { %s335_s18 = sand.u32 1, %s674_s12   ;;  %p937_p10 = scmp.ne.s32.totalorder %s927_s19, 0 }
 0x1e0   : > { %p938_p13 = scmp.ge.s32.totalorder %s686_s15, 2  ;;  %s336_s20 = scalar_lea.sflag [#allocation4], %s335_s18 }
 0x1e2   : > { %p511_p3 = pnand %p938_p13, %p937_p10 }
 0x1e4   : > { %669 = dma.done.wait (!%p511_p3), %s336_s20, 128  }
 0x1e5   : > { %671 = vsyncadd (!%p511_p3), %s336_s20, 4294967168  ;;  %p17_p7 = scmp.ge.s32.totalorder %s772_s24, 4   ;;  %s939_s12 = smov %s678_s13 }
 0x1e6   : > { %s940_s13 = smov %s682_s14  ;;  %s941_s14 = smov %s803_s17 }
 0x1e7   : > { %s942_s15 = smov %s772_s24  ;;  %19 = sbr.rel (!%p17_p7) target bundleno = 6 (0x6), region = 81 }
 0x1ee   :  { %341 = vsyncpa [#allocation3], 1 }
 0x1ef   :  { %343 = vsyncpa [#allocation3 + $0x1], 1 }
 0x1f0   :  { %344 = vsyncpa [#allocation6], 1 }
 0x1f1   :  { %345 = vsyncpa [#allocation4], 1 }
 0x1f2   :  { %347 = vsyncpa [#allocation4 + $0x1], 1 }

// kernel: tpu_custom_call.1
= control target key start
LH: loop header
LB: loop body
LE: loop exit
PB: predicated region body
PF: predicated region fallthrough
CT: control target
= control target key end

     0   :  { %8 = vsyncpa [#allocation3], 0  ;;  %s919_s0 = inlined_call_operand.hbm [shape: f32[16,128], index: 0, kind: input, shape index: {}]   ;;  %s920_s1 = inlined_call_operand.hbm [shape: f32[128,128], index: 1, kind: input, shape index: {}]   ;;  %s921_s2 = inlined_call_operand.vmem [shape: f32[1,128], index: 2, kind: input, shape index: {}]   ;;  %s922_s3 = inlined_call_operand.hbm [shape: f32[16,128], index: 3, kind: output, shape index: {}]  }
   0x1   :  { %10 = vsyncpa [#allocation3 + $0x1], 0 }
   0x2   :  { %11 = vsyncpa [#allocation6], 0 }
   0x3   :  { %12 = vsyncpa [#allocation4], 0 }
   0x4   :  { %14 = vsyncpa [#allocation4 + $0x1], 0  ;;  %s716_s12 = smov 0   ;;  %s718_s13 = smov 0  }
   0x5   :  { %s720_s14 = smov 0   ;;  %s722_s15 = smov 0  }
   0x6 LB: > { %s737_s16 = sadd.s32 4294967295, %s686_s15   ;;  %s403_s17 = sadd.s32 4294967294, %s686_s15   ;;  %s686_s15 = sphi %s722_s15, %s942_s15   ;;  %s682_s14 = sphi %s720_s14, %s941_s14   ;;  %s678_s13 = sphi %s718_s13, %s940_s13   ;;  %s674_s12 = sphi %s716_s12, %s939_s12  }
   0x7   : > { %p40_p0 = scmp.ne.s32.totalorder %s678_s13, %s674_s12  ;;  %p923_p1 = scmp.eq.s32.totalorder %s737_s16, 0 }
   0x8   : > { %p112_p3 = scmp.eq.s32.totalorder %s403_s17, 1  ;;  %p404_p5 = scmp.ge.s32.totalorder %s686_s15, 1 }
   0x9   : > { %p746_p4 = por %p923_p1, %p40_p0  ;;  %p119_p7 = scmp.lt.s32.totalorder %s686_s15, 3 }
   0xa   : > { %p751_p6 = por %p112_p3, %p40_p0  ;;  %s688_s21 = smov [#allocation5]  }
   0xb   : > { %s926_s18 = scalar_select %p746_p4, 1, 0 }
   0xc   : > { %s927_s19 = scalar_select %p751_p6, 1, 0 }
   0xd   : > { %p756_p8 = pnand %p404_p5, %p119_p7  ;;  %s131_s22 = sshll.u32 %s688_s21, 4  ;;  %s760_s22 = int_to_ptr.vmem [resolvable:$true] %s131_s22 }
   0xe   : > { %s772_s24 = sadd.s32 1, %s686_s15   ;;  %s27_s25 = sadd.s32 1, %s682_s14 }
   0xf   : > { %s928_s20 = scalar_select %p756_p8, 1, 0 }
  0x10   : > { %p502_p9 = pneg %p756_p8  ;;  %s24_s26 = ssub.s32 %s686_s15, %s772_s24 }
  0x11   : > { %s558_s29 = scalar_lea.hbm %s920_s1, 2048 }
  0x12   : > { %p767_p11 = pnand %p502_p9, %p923_p1  ;;  %p559_p12 = scmp.ne.s32.totalorder %s920_s1, %s558_s29 }
  0x13   : > { %p565_p5 = scmp.lt.u32.totalorder %s558_s29, %s920_s1 }
  0x14   : > { %p560_p13 = pneg %p767_p11 }
  0x16   : > { %p561_p0 = pnand %p560_p13, %p559_p12 }
  0x18   : > { %p562_p3 = pneg %p561_p0 }
  0x1a   : > { %p567_p7 = pnand %p565_p5, %p562_p3 }
  0x1c   : > { %570 = shalt.err (!%p567_p7)
}
  0x1d   : > { %s571_s7 = scalar_lea.vmem %s760_s22, 2048  ;;  %p579_p2 = scmp.lt.s32.totalorder %s760_s22, %s760_s22 }
  0x1e   : > { %p572_p9 = scmp.ne.s32.totalorder %s760_s22, %s571_s7  ;;  %p580_p6 = scmp.lt.s32.totalorder %s571_s7, %s571_s7 }
  0x20   : > { %p574_p10 = pnand %p572_p9, %p560_p13  ;;  %p581_p4 = por %p580_p6, %p579_p2 }
  0x22   : > { %p575_p1 = pneg %p574_p10 }
  0x24   : > { %p582_p8 = pnand %p581_p4, %p575_p1 }
  0x26   : > { %585 = shalt.err (!%p582_p8)
}
  0x27   : > { %s689_s8 = smov 128   ;;  %s690_s9 = smov 8  }
  0x28   : > { %505 = dma.hbm_to_vmem [thread:$0]  (!%p767_p11), %s920_s1, 2048, %s760_s22, [#allocation6], %s689_s8, %s689_s8, %s690_s9  }
  0x29   : > { %p25_p2 = scmp.eq.s32.totalorder %s24_s26, 0  ;;  %p34_p1 = scmp.ne.s32.totalorder %s682_s14, %s678_s13 }
  0x2a   : > { %p35_p4 = scmp.eq.s32.totalorder %s686_s15, 0  ;;  %p515_p6 = scmp.lt.s32.totalorder %s686_s15, 2 }
  0x2b   : > { %s803_s17 = scalar_select %p25_p2, %s682_s14, %s27_s25  }
  0x2c   : > { %p36_p8 = por %p35_p4, %p34_p1  ;;  %p930_p10 = scmp.eq.s32.totalorder %s737_s16, 1 }
  0x2d   : > { %s148_s27 = sand.u32 1, %s682_s14   ;;  %s408_s28 = sshll.u32 %s686_s15, 7 }
  0x2e   : > { %p807_p12 = por %p930_p10, %p34_p1  ;;  %s407_s29 = sshll.u32 %s148_s27, 3 }
  0x2f   : > { %s816_s4 = scalar_lea.hbm %s919_s0, %s408_s28  ;;  %s152_s22 = scalar_lea.vmem [#allocation2], %s407_s29 }
  0x30   : > { %s159_s25 = sshll.u32 %s152_s22, 4  ;;  %p818_p11 = pnand %p515_p6, %p36_p8  ;;  %s822_s25 = int_to_ptr.vmem [resolvable:$true] %s159_s25 }
  0x31   : > { %s149_s5 = scalar_lea.sflag [#allocation3], %s148_s27  ;;  %s586_s6 = scalar_lea.hbm %s816_s4, 128 }
  0x32   : > { %p587_p13 = scmp.ne.s32.totalorder %s816_s4, %s586_s6  ;;  %p588_p0 = pneg %p818_p11 }
  0x33   : > { %s591_s9 = scalar_lea.hbm %s919_s0, 256  ;;  %p592_p7 = scmp.lt.u32.totalorder %s816_s4, %s919_s0 }
  0x34   : > { %p589_p3 = pnand %p588_p0, %p587_p13  ;;  %p593_p9 = scmp.lt.u32.totalorder %s591_s9, %s586_s6 }
  0x35   : > { %p595_p1 = scmp.lt.u32.totalorder %s586_s6, %s816_s4 }
  0x36   : > { %p590_p5 = pneg %p589_p3  ;;  %p594_p2 = por %p593_p9, %p592_p7 }
  0x38   : > { %p596_p4 = por %p595_p1, %p594_p2 }
  0x3a   : > { %p597_p6 = pnand %p596_p4, %p590_p5 }
  0x3c   : > { %600 = shalt.err (!%p597_p6)
}
  0x3d   : > { %s601_s27 = scalar_lea.vmem %s822_s25, 128  ;;  %s691_s28 = smov [#allocation2]  }
  0x3e   : > { %p602_p8 = scmp.ne.s32.totalorder %s822_s25, %s601_s27  ;;  %s606_s29 = sshll.u32 %s691_s28, 4  ;;  %s607_s29 = int_to_ptr.vmem [resolvable:$false] %s606_s29 }
  0x3f   : > { %s608_s23 = scalar_lea.vmem %s607_s29, 256  ;;  %p609_p3 = scmp.lt.s32.totalorder %s822_s25, %s607_s29 }
  0x40   : > { %p604_p10 = pnand %p602_p8, %p588_p0  ;;  %p610_p7 = scmp.lt.s32.totalorder %s608_s23, %s601_s27 }
  0x42   : > { %p605_p13 = pneg %p604_p10  ;;  %p611_p9 = por %p610_p7, %p609_p3 }
  0x44   : > { %p612_p2 = pnand %p611_p9, %p605_p13 }
  0x46   : > { %615 = shalt.err (!%p612_p2)
}
  0x47   : > { %509 = dma.hbm_to_vmem [thread:$0]  (!%p818_p11), %s816_s4, 128, %s822_s25, %s149_s5  }
  0x48   : > { %p933_p5 = scmp.ne.s32.totalorder %s928_s20, 0 }
  0x49   : > { %s852_s30 = sand.u32 (!%p933_p5), 1, %s678_s13   ;;  %p934_p0 = scmp.ne.s32.totalorder (!%p933_p5), %s926_s18, 0 }
  0x4a   : > { %168 = sbr.rel (%p933_p5) target bundleno = 479 (0x1df), region = 32  ;;  %s410_s22 = sshll.u32 (!%p933_p5), %s852_s30, 3 }
  0x4b   : > { %s171_s6 = scalar_lea.sflag (!%p933_p5), [#allocation3], %s852_s30  ;;  %s174_s7 = scalar_lea.vmem (!%p933_p5), [#allocation2], %s410_s22 }
  0x51   : > { %661 = dma.done.wait (%p934_p0), %s171_s6, 128  }
  0x52   : > { %663 = vsyncadd (%p934_p0), %s171_s6, 4294967168  ;;  %p935_p11 = scmp.eq.s32.totalorder %s737_s16, 0 }
  0x54   : > { %665 = dma.done.wait (%p935_p11), [#allocation6], 2048   ;;  %p936_p1 = pmov %p935_p11 }
  0x55   : > { %v692_v0 = vmov 0.0|0.0   ;;  %v201_v1 = vld [vmem:[%s174_s7] sm:$0xff]  ;;  %v215_v2 = vld [vmem:[#allocation5] sm:$0xff]  ;;  %v216_v3 = vld [vmem:[#allocation5 + $0x8] sm:$0xff]  ;;  %vm693_vm0 = vmmov 0   ;;  %v694_v23 = vmov 0.0  }
  0x56   : > { %667 = vsyncadd (%p936_p1), [#allocation6], 4294965248  ;;  %470 = vmatprep.subr.bf16.mxu0 %v692_v0  ;;  %202 = vadd.xlane.f32.xlu0 %v201_v1  ;;  %v204_v4 = vmul.f32 %v201_v1, %v201_v1  ;;  %v471_v5 = vpack.c.bf16 %v216_v3, %v215_v2  ;;  %v217_v6 = vld [vmem:[#allocation5 + $0x10] sm:$0xff]  ;;  %v218_v7 = vld [vmem:[#allocation5 + $0x18] sm:$0xff]  ;;  %s415_s4 = sshll.u32 %s737_s16, 7  ;;  %s200_s25 = scalar_lea.vmem [#allocation7], %s410_s22 }
  0x57   : > { %v474_v8 = vpack.c.bf16 %v218_v7, %v217_v6  ;;  %v219_v9 = vld [vmem:[#allocation5 + $0x20] sm:$0xff]  ;;  %v220_v10 = vld [vmem:[#allocation5 + $0x28] sm:$0xff]  ;;  %v221_v12 = vld [vmem:[#allocation5 + $0x30] sm:$0xff]  ;;  %467 = vmatprep.mubr.msk.f32.mxu0 %vm693_vm0, %v694_v23  ;;  %s323_s26 = sshll.u32 %s200_s25, 4  ;;  %s875_s9 = scalar_lea.hbm %s922_s3, %s415_s4  ;;  %s877_s26 = int_to_ptr.vmem [resolvable:$true] %s323_s26 }
  0x58   : > { %472 = vmatpush3.bf16.msra.mxu0 %v471_v5  ;;  %v477_v11 = vpack.c.bf16 %v220_v10, %v219_v9  ;;  %v222_v13 = vld [vmem:[#allocation5 + $0x38] sm:$0xff]  ;;  %v223_v15 = vld [vmem:[#allocation5 + $0x40] sm:$0xff]  ;;  %v224_v16 = vld [vmem:[#allocation5 + $0x48] sm:$0xff]  ;;  %s310_s10 = scalar_lea.sflag [#allocation4], %s852_s30  ;;  %s616_s11 = scalar_lea.vmem %s877_s26, 128 }
  0x59   : > { %473 = vmatprep.subr.bf16.mxu0 %v692_v0  ;;  %v480_v14 = vpack.c.bf16 %v222_v13, %v221_v12  ;;  %v483_v17 = vpack.c.bf16 %v224_v16, %v223_v15  ;;  %v225_v18 = vld [vmem:[#allocation5 + $0x50] sm:$0xff]  ;;  %v226_v19 = vld [vmem:[#allocation5 + $0x58] sm:$0xff]  ;;  %v227_v21 = vld [vmem:[#allocation5 + $0x60] sm:$0xff]  ;;  %p617_p4 = scmp.ne.s32.totalorder %s877_s26, %s616_s11  ;;  %s695_s16 = smov [#allocation7]  }
  0x5a   : > { %205 = vadd.xlane.f32.xlu0 %v204_v4  ;;  %v486_v20 = vpack.c.bf16 %v226_v19, %v225_v18  ;;  %v228_v22 = vld [vmem:[#allocation5 + $0x68] sm:$0xff]  ;;  %v229_v25 = vld [vmem:[#allocation5 + $0x70] sm:$0xff]  ;;  %v230_v26 = vld [vmem:[#allocation5 + $0x78] sm:$0xff]  ;;  %s620_s27 = sshll.u32 %s695_s16, 4  ;;  %s621_s27 = int_to_ptr.vmem [resolvable:$false] %s620_s27 }
  0x5b   : > { %v489_v24 = vpack.c.bf16 %v228_v22, %v227_v21  ;;  %v492_v27 = vpack.c.bf16 %v230_v26, %v229_v25  ;;  %v413_v38 = vld [vmem:[%s921_s2] ss:$0 sm:$0xff]  ;;  %p618_p6 = pnand %p617_p4, %p807_p12  ;;  %s622_s28 = scalar_lea.vmem %s621_s27, 256 }
  0x5c   : > { %475 = vmatpush3.bf16.msra.mxu0 %v474_v8  ;;  %p623_p10 = scmp.lt.s32.totalorder %s877_s26, %s621_s27  ;;  %p624_p13 = scmp.lt.s32.totalorder %s622_s28, %s616_s11 }
  0x5d   : > { %476 = vmatprep.subr.bf16.mxu0 %v692_v0  ;;  %p619_p8 = pneg %p618_p6 }
  0x5e   : > { %p625_p3 = por %p624_p13, %p623_p10 }
  0x60   : > { %478 = vmatpush3.bf16.msra.mxu0 %v477_v11  ;;  %p626_p7 = pnand %p625_p3, %p619_p8 }
  0x61   : > { %479 = vmatprep.subr.bf16.mxu0 %v692_v0 }
  0x64   : > { %481 = vmatpush3.bf16.msra.mxu0 %v480_v14 }
  0x65   : > { %482 = vmatprep.subr.bf16.mxu0 %v692_v0 }
  0x68   : > { %484 = vmatpush3.bf16.msra.mxu0 %v483_v17 }
  0x69   : > { %485 = vmatprep.subr.bf16.mxu0 %v692_v0 }
  0x6c   : > { %487 = vmatpush3.bf16.msra.mxu0 %v486_v20 }
  0x6d   : > { %488 = vmatprep.subr.bf16.mxu0 %v692_v0 }
  0x70   : > { %490 = vmatpush3.bf16.msra.mxu0 %v489_v24 }
  0x71   : > { %491 = vmatprep.subr.bf16.mxu0 %v692_v0 }
  0x74   : > { %493 = vmatpush3.bf16.msra.mxu0 %v492_v27 }
  0xe3   : > { %v203_v28 = vpop.xlane.xlu0 %202 }
  0xe4   : > { %v207_v29 = vmul.f32 0.03125, %v203_v28 }
  0xe6   : > { %v209_v31 = vmul.f32 %v207_v29, %v207_v29  ;;  %v213_v35 = vsub.f32 %v201_v1, %v207_v29 }
  0xe7   : > { %v206_v30 = vpop.xlane.xlu0 %205 }
  0xe8   : > { %v208_v32 = vmul.f32 0.03125, %v206_v30 }
  0xea   : > { %v210_v33 = vsub.f32 %v208_v32, %v209_v31 }
  0xec   : > { %v211_v34 = vadd.f32 1e-05, %v210_v33 }
  0xee   : > { %556 = vrsqrt.f32 %v211_v34 }
  0xf8   : > { %v557_v36 = vpop.eup %556 }
  0xf9   : > { %v214_v37 = vmul.f32 %v557_v36, %v213_v35 }
  0xfb   : > { %468 = vmatmul.mubr.f32.vlgmr.msra.gmra.mrb[0].mxu0 %v214_v37 }
 0x1ce   : > { %v304_v39 = vpop.f32.mrb[0].mxu0 }
 0x1cf   : > { %v305_v40 = vadd.f32 %v413_v38, %v304_v39  ;;  %v469_v41 = vpop.f32.mrb[1].mxu0 }
 0x1d1   : > { %308 = vst [vmem:[%s200_s25] sm:$0xff] %v305_v40 }
 0x1d2   : > { %629 = shalt.err (!%p626_p7)
}
 0x1d3   : > { %s630_s29 = scalar_lea.hbm %s875_s9, 128  ;;  %s634_s22 = scalar_lea.hbm %s922_s3, 256 }
 0x1d4   : > { %p631_p9 = scmp.ne.s32.totalorder %s875_s9, %s630_s29  ;;  %p635_p0 = scmp.lt.u32.totalorder %s875_s9, %s922_s3 }
 0x1d5   : > { %p636_p11 = scmp.lt.u32.totalorder %s634_s22, %s630_s29  ;;  %p638_p4 = scmp.lt.u32.totalorder %s630_s29, %s875_s9 }
 0x1d6   : > { %p632_p2 = pnand %p631_p9, %p807_p12 }
 0x1d7   : > { %p637_p1 = por %p636_p11, %p635_p0 }
 0x1d8   : > { %p633_p5 = pneg %p632_p2 }
 0x1d9   : > { %p639_p6 = por %p638_p4, %p637_p1 }
 0x1db   : > { %p640_p8 = pnand %p639_p6, %p633_p5 }
 0x1dd   : > { %643 = shalt.err (!%p640_p8)
}
 0x1de   : > { %500 = dma.vmem_to_hbm [thread:$0]  (%p807_p12), %s877_s26, 128, %s875_s9, %s310_s10  }
 0x1df PF: > { %s335_s18 = sand.u32 1, %s674_s12   ;;  %p937_p10 = scmp.ne.s32.totalorder %s927_s19, 0 }
 0x1e0   : > { %p938_p13 = scmp.ge.s32.totalorder %s686_s15, 2  ;;  %s336_s20 = scalar_lea.sflag [#allocation4], %s335_s18 }
 0x1e2   : > { %p511_p3 = pnand %p938_p13, %p937_p10 }
 0x1e4   : > { %669 = dma.done.wait (!%p511_p3), %s336_s20, 128  }
 0x1e5   : > { %671 = vsyncadd (!%p511_p3), %s336_s20, 4294967168  ;;  %p17_p7 = scmp.ge.s32.totalorder %s772_s24, 4   ;;  %s939_s12 = smov %s678_s13 }
 0x1e6   : > { %s940_s13 = smov %s682_s14  ;;  %s941_s14 = smov %s803_s17 }
 0x1e7   : > { %s942_s15 = smov %s772_s24  ;;  %19 = sbr.rel (!%p17_p7) target bundleno = 6 (0x6), region = 81 }
 0x1ee   :  { %341 = vsyncpa [#allocation3], 1 }
 0x1ef   :  { %343 = vsyncpa [#allocation3 + $0x1], 1 }
 0x1f0   :  { %344 = vsyncpa [#allocation6], 1 }
 0x1f1   :  { %345 = vsyncpa [#allocation4], 1 }
 0x1f2   :  { %347 = vsyncpa [#allocation4 + $0x1], 1 }

</bundles_post_ra>
